<compile_context>
chip_gen: v7x
topology: tpu7x:2x2x1
jax: 0.10.0
libtpu: 0.0.40
codegen_flags: <defaults>
</compile_context>

<pallas_src>
import functools

import jax
import jax.numpy as jnp
from jax import lax
from jax.experimental import pallas as pl
from jax.experimental.pallas import tpu as pltpu


# ------------------------------ small helpers ------------------------------ #

def _round_up(x, m):
    return ((x + m - 1) // m) * m


def _pick_row_tile(m, target=512):
    for t in (512, 256, 128, 64, 32, 16, 8):
        if t <= target and t <= m and m % t == 0:
            return t
    return m


def _num_solve_blocks(C):
    # Blocked forward substitution only when every sub-block spans at least a
    # full sublane tile (8 rows):  C=128 -> 4x32, C=16 -> 2x8, C=8 -> dense.
    for nb in (4, 2):
        if C % nb == 0 and (C // nb) % 8 == 0:
            return nb
    return 1


def _neumann_inv_unit_lower(Bii, r, mm):
    """(I + Bii)^-1 for a strictly lower triangular (r, r) block.

    Bii is nilpotent, so the Neumann series terminates after r terms; the
    doubling loop needs ceil(log2(r)) - 1 squarings.
    """
    rowi = lax.broadcasted_iota(jnp.int32, (r, r), 0)
    coli = lax.broadcasted_iota(jnp.int32, (r, r), 1)
    eye = (rowi == coli).astype(jnp.float32)
    pw = -Bii
    minv = eye + pw
    for _ in range(max(0, (r - 1).bit_length() - 1)):
        pw = mm(pw, pw)
        minv = minv + mm(minv, pw)
    return minv


def _solve_unit_lower(Bm, rhs, C, mm):
    """Solve (I + Bm) U = rhs, Bm strictly lower triangular (C, C).

    Blocked forward substitution (diagonal-block Neumann inverses plus
    rectangular update matmuls): ~O(C^2 (r + Dv)) MXU work instead of the
    O(C^3 log C) dense doubling of the full matrix.
    """
    nb = _num_solve_blocks(C)
    r = C // nb
    ub = []
    for i in range(nb):
        lo = i * r
        rhs_i = rhs[lo:lo + r, :]
        if i:
            uprev = ub[0] if i == 1 else jnp.concatenate(ub, axis=0)
            rhs_i = rhs_i - mm(Bm[lo:lo + r, 0:lo], uprev)
        minv = _neumann_inv_unit_lower(Bm[lo:lo + r, lo:lo + r], r, mm)
        ub.append(mm(minv, rhs_i))
    return ub[0] if nb == 1 else jnp.concatenate(ub, axis=0)


# --------------------------- Pallas kernel bodies --------------------------- #

def _fwm_kernel(h_ref, wq_ref, wk_ref, wv_ref, wb_ref, o_ref,
                w_ref, kacc_ref, strict_ref, incl_ref, *,
                d_head, n_roll, chunk, scale, eps, cdt):
    """Fused qkvb-projection + normalized-DPFP chunked delta-rule memory.

    Grid: (bsz, n_head, n_chunks); per step:
      h_ref   : (C, d_model)      batch-major h rows of this (batch, chunk)
      wq/wk/wv: (d_model, d_head)  per-head projection slices (resident)
      wb_ref  : (d_model, 1)
      o_ref   : (C, d_head)        layer output for this (head, batch, chunk)
      w_ref   : (d_head, Dk)       fast weight W^T, carried across chunks
      kacc_ref: (1, Dk)            running sum of DPFP keys from prev. chunks
      strict/incl_ref: (C, C)      causal masks, built once per sweep
    """
    C = chunk
    D2 = 2 * d_head
    c = pl.program_id(2)
    f32 = jnp.float32

    def mm(a, b):      # a @ b          (compute-dtype MXU operands, f32 acc)
        return lax.dot_general(a.astype(cdt), b.astype(cdt),
                               (((1,), (0,)), ((), ())),
                               preferred_element_type=f32)

    def mmt(a, b):     # a @ b.T
        return lax.dot_general(a.astype(cdt), b.astype(cdt),
                               (((1,), (1,)), ((), ())),
                               preferred_element_type=f32)

    def mtm(a, b):     # a.T @ b
        return lax.dot_general(a.astype(cdt), b.astype(cdt),
                               (((0,), (0,)), ((), ())),
                               preferred_element_type=f32)

    def mm32(a, b):    # exact f32 matmul (solver / carry-critical path)
        return lax.dot_general(a, b, (((1,), (0,)), ((), ())),
                               preferred_element_type=f32)

    @pl.when(c == 0)
    def _init():
        w_ref[...] = jnp.zeros_like(w_ref)
        kacc_ref[...] = jnp.zeros_like(kacc_ref)
        row = lax.broadcasted_iota(jnp.int32, (C, C), 0)
        col = lax.broadcasted_iota(jnp.int32, (C, C), 1)
        strict_ref[...] = (col < row).astype(f32)
        incl_ref[...] = (col <= row).astype(f32)

    # ---- fused qkvb projection for this (batch, head, chunk) ---------------
    hb = h_ref[...]                                          # (C, d_model)
    q_in = mm(hb, wq_ref[...])                               # (C, d_head) f32
    k_in = mm(hb, wk_ref[...])
    v = mm(hb, wv_ref[...])
    blog = mm(hb, wb_ref[...])                               # (C, 1)
    beta = 1.0 / (1.0 + jnp.exp(-blog))                      # sigmoid

    # ---- DPFP features: VPU relu/mul + lane rotations, no constant matmuls -
    def dpfp(x):
        y = jnp.concatenate([jnp.maximum(x, 0.0), jnp.maximum(-x, 0.0)],
                            axis=-1)                         # (C, 2*d_head)
        parts = []
        for i in range(1, n_roll + 1):
            s = i % D2
            yr = y if s == 0 else jnp.concatenate(
                [y[:, D2 - s:], y[:, :D2 - s]], axis=-1)     # roll(y, s)
            parts.append(y * yr)
        f = jnp.concatenate(parts, axis=-1)                  # (C, Dk)
        ssum = jnp.sum(f, axis=-1, keepdims=True)
        # Exact division (carry path); the where() guard only kicks in for
        # all-zero rows (zero-padded time steps), where torch would give NaN.
        return f / jnp.where(ssum == 0.0, 1.0, ssum)

    Q = dpfp(q_in)                                           # (C, Dk) f32
    K = dpfp(k_in)

    Wt = w_ref[...]                                          # (d_head, Dk) f32
    kacc = kacc_ref[...]                                     # (1, Dk) f32
    strict = strict_ref[...]
    incl = incl_ref[...]
    gidx = c * C + lax.broadcasted_iota(jnp.int32, (C, 1), 0)

    # ---- key / query normalisation denominators ----------------------------
    S = mmt(K, K)                                            # (C, C)
    P = mmt(Q, K)
    kd = (jnp.sum(S * strict, axis=-1, keepdims=True)
          + jnp.sum(K * kacc, axis=-1, keepdims=True))       # exclusive cumsum
    kd = jnp.where(gidx == 0, 1.0, kd)
    denom = (jnp.sum(P * incl, axis=-1, keepdims=True)
             + jnp.sum(Q * kacc, axis=-1, keepdims=True))    # inclusive cumsum

    inv_kd = 1.0 / (kd + eps)                                # exact: feeds carried W
    beta_eff = beta * kd
    Keff = K * inv_kd

    # ---- chunked delta rule (WY-style), MXU matmuls -------------------------
    A = mmt(Keff, Keff)                                      # (C, C)
    Bm = beta_eff * (A * strict)                             # diag(beta) tril(A,-1)
    rhs = beta_eff * (v - mmt(Keff, Wt))                     # (C, Dv)
    U = _solve_unit_lower(Bm, rhs, C, mm32)                  # (I+B) U = rhs, f32

    Pq = mmt(Q, Keff)                                        # (C, C)
    out = mmt(Q, Wt) + mm(Pq * incl, U)                      # (C, Dv)
    out = (scale * out) * pl.reciprocal(denom + eps, approx=True)  # output-only
    o_ref[...] = out.astype(o_ref.dtype)

    # ---- carries to the next chunk ------------------------------------------
    w_ref[...] = Wt + mtm(U, Keff)                           # (d_head, Dk)
    kacc_ref[...] = kacc + jnp.sum(K, axis=0, keepdims=True)


def _oproj_ln_kernel(x_ref, w_ref, h_ref, g_ref, b_ref, o_ref, acc_ref, *,
                     n_head, ln_eps):
    """Per-head accumulated output projection + residual + post-LayerNorm.

    Grid: (M_tiles, n_head) with the head axis as the ("arbitrary") reduction.
      x_ref: (tm, d_head)    this head's layer_out rows
      w_ref: (d_head, d_model)
      h_ref: (tm, d_model)   residual input (f32)
      acc_ref: (tm, d_model) f32 scratch accumulator (lane-dense)
    """
    hd = pl.program_id(1)

    @pl.when(hd == 0)
    def _():
        acc_ref[...] = jnp.zeros_like(acc_ref)

    acc_ref[...] += lax.dot_general(x_ref[...], w_ref[...],
                                    (((1,), (0,)), ((), ())),
                                    preferred_element_type=jnp.float32)

    @pl.when(hd == n_head - 1)
    def _():
        z = h_ref[...] + acc_ref[...]
        mu = jnp.mean(z, axis=-1, keepdims=True)
        var = jnp.mean(jnp.square(z - mu), axis=-1, keepdims=True)
        zn = (z - mu) * lax.rsqrt(var + ln_eps)
        o_ref[...] = (zn * g_ref[...] + b_ref[...]).astype(o_ref.dtype)


# ------------------------------ param prep ---------------------------------- #

def prepare_params(params, *, n_head, d_head, matmul_dtype=jnp.bfloat16):
    """One-time re-layout of the PyTorch weights into kernel layouts.

    Done once outside forward() so no per-call transposes hit HBM.
    """
    D = d_head
    F = 3 * D + 1
    d_model = params["w_qkvb"].shape[1]
    w = params["w_qkvb"].reshape(n_head, F, d_model)              # (H, F, d_model)
    wq = jnp.transpose(w[:, 0:D, :], (0, 2, 1)).astype(matmul_dtype)
    wk = jnp.transpose(w[:, D:2 * D, :], (0, 2, 1)).astype(matmul_dtype)
    wv = jnp.transpose(w[:, 2 * D:3 * D, :], (0, 2, 1)).astype(matmul_dtype)
    wb = jnp.transpose(w[:, 3 * D:3 * D + 1, :], (0, 2, 1)).astype(matmul_dtype)
    wo = params["w_o"].T.reshape(n_head, D, d_model).astype(matmul_dtype)
    return {
        "wq": wq, "wk": wk, "wv": wv, "wb": wb, "wo": wo,         # (H, dm, D)...
        "ln_g": params["ln_g"].reshape(1, d_model).astype(jnp.float32),
        "ln_b": params["ln_b"].reshape(1, d_model).astype(jnp.float32),
    }


# ------------------------------- forward ------------------------------------ #

def forward_pallas(h, kp, *, n_head, d_head, n_roll, eps,
                   chunk_size=128, ln_eps=1e-5):
    """h: (slen, bsz, d_model) f32 -> (slen, bsz, d_model) f32."""
    slen, bsz, d_model = h.shape
    cdt = kp["wq"].dtype
    scale = 1.0 / d_head ** 0.5
    Dk = 2 * n_roll * d_head

    # Chunking: pad slen to a multiple of the chunk (never divisor-hunt).
    # chunk_size=128 matches the v5e MXU; sweep 256 on v6e/v7x.
    assert chunk_size % 8 == 0
    C = chunk_size if slen >= chunk_size else _round_up(slen, 8)
    slen_p = _round_up(slen, C)
    n_chunks = slen_p // C

    hp = h if slen_p == slen else jnp.pad(h, ((0, slen_p - slen), (0, 0), (0, 0)))
    # Batch-major rows: per-(batch, chunk) row blocks are contiguous.
    h_bm = jnp.transpose(hp, (1, 0, 2)).reshape(bsz * slen_p, d_model)
    M = bsz * slen_p

    # ---- (1) fused projection + normalized DPFP delta-rule fast weights -----
    fwm_kernel = functools.partial(
        _fwm_kernel, d_head=d_head, n_roll=n_roll, chunk=C,
        scale=scale, eps=eps, cdt=cdt)

    itemsize = jnp.dtype(cdt).itemsize
    mac = (C * d_model * (3 * d_head + 1)
           + 4 * C * C * Dk
           + 3 * C * Dk * d_head
           + C * C * d_head
           + 2 * C * C * max(8, C // 4))
    steps = bsz * n_head * n_chunks
    cost = pl.CostEstimate(
        flops=2 * mac * steps,
        transcendentals=3 * C * steps,
        bytes_accessed=(n_head * M * d_model * itemsize
                        + n_head * M * d_head * itemsize
                        + 4 * n_head * d_model * (3 * d_head + 1) * itemsize))

    layer_out = pl.pallas_call(
        fwm_kernel,
        out_shape=jax.ShapeDtypeStruct((n_head, M, d_head), cdt),
        grid_spec=pltpu.PrefetchScalarGridSpec(
            num_scalar_prefetch=0,
            grid=(bsz, n_head, n_chunks),
            in_specs=[
                pl.BlockSpec((C, d_model),
                             lambda b, hd, c: (b * n_chunks + c, 0)),
                pl.BlockSpec((None, d_model, d_head),
                             lambda b, hd, c: (hd, 0, 0)),
                pl.BlockSpec((None, d_model, d_head),
                             lambda b, hd, c: (hd, 0, 0)),
                pl.BlockSpec((None, d_model, d_head),
                             lambda b, hd, c: (hd, 0, 0)),
                pl.BlockSpec((None, d_model, 1),
                             lambda b, hd, c: (hd, 0, 0)),
            ],
            out_specs=pl.BlockSpec((None, C, d_head),
                                   lambda b, hd, c: (hd, b * n_chunks + c, 0)),
            scratch_shapes=[
                pltpu.VMEM((d_head, Dk), jnp.float32),   # W^T (carried)
                pltpu.VMEM((1, Dk), jnp.float32),        # running key cumsum
                pltpu.VMEM((C, C), jnp.float32),         # strict causal mask
                pltpu.VMEM((C, C), jnp.float32),         # inclusive causal mask
            ]),
        compiler_params=pltpu.CompilerParams(
            dimension_semantics=("parallel", "parallel", "arbitrary")),
        cost_estimate=cost,
    )(h_bm.astype(cdt), kp["wq"], kp["wk"], kp["wv"], kp["wb"])

    # ---- (2) output projection + residual + post-LayerNorm ------------------
    tm = _pick_row_tile(M)
    oproj_kernel = functools.partial(_oproj_ln_kernel, n_head=n_head,
                                     ln_eps=ln_eps)
    out_bm = pl.pallas_call(
        oproj_kernel,
        out_shape=jax.ShapeDtypeStruct((M, d_model), jnp.float32),
        grid_spec=pltpu.PrefetchScalarGridSpec(
            num_scalar_prefetch=0,
            grid=(M // tm, n_head),
            in_specs=[
                pl.BlockSpec((None, tm, d_head), lambda i, hd: (hd, i, 0)),
                pl.BlockSpec((None, d_head, d_model), lambda i, hd: (hd, 0, 0)),
                pl.BlockSpec((tm, d_model), lambda i, hd: (i, 0)),
                pl.BlockSpec((1, d_model), lambda i, hd: (0, 0)),
                pl.BlockSpec((1, d_model), lambda i, hd: (0, 0)),
            ],
            out_specs=pl.BlockSpec((tm, d_model), lambda i, hd: (i, 0)),
            scratch_shapes=[pltpu.VMEM((tm, d_model), jnp.float32)]),
        compiler_params=pltpu.CompilerParams(
            dimension_semantics=("parallel", "arbitrary")),
    )(layer_out, kp["wo"], h_bm, kp["ln_g"], kp["ln_b"])

    out = out_bm.reshape(bsz, slen_p, d_model).transpose(1, 0, 2)
    return out[:slen]


# ------------------------ pure-JAX reference (check) ------------------------ #

def dpfp_feature(x, n_roll):
    x = jnp.concatenate([jax.nn.relu(x), jax.nn.relu(-x)], axis=-1)
    rolls = [x * jnp.roll(x, shift=i, axis=-1) for i in range(1, n_roll + 1)]
    x = jnp.concatenate(rolls, axis=-1)
    return x / jnp.sum(x, axis=-1, keepdims=True)


def forward_reference(h, params, *, n_head, d_head, n_roll, eps):
    slen, bsz, d_model = h.shape
    scale = 1.0 / d_head ** 0.5
    qkvb = jnp.einsum("lbd,nd->lbn", h, params["w_qkvb"])
    qkvb = qkvb.reshape(slen, bsz, n_head, 3 * d_head + 1)
    q, k, v, beta = jnp.split(qkvb, [d_head, 2 * d_head, 3 * d_head], axis=-1)
    beta = jax.nn.sigmoid(beta)
    perm = (1, 2, 0, 3)
    q, k, v, beta = (t.transpose(perm) for t in (q, k, v, beta))
    qf = dpfp_feature(q, n_roll)
    kf = dpfp_feature(k, n_roll)

    B, H, L, Dk = qf.shape
    denom_acc = jnp.cumsum(kf, axis=2)
    key_denom = jnp.concatenate(
        [jnp.zeros((B, H, 1, Dk), qf.dtype), denom_acc[:, :, :-1, :]], axis=2)
    key_denom = jnp.sum(key_denom * kf, axis=-1)
    key_denom = jnp.concatenate(
        [jnp.ones((B, H, 1), qf.dtype), key_denom[:, :, 1:]], axis=2)[..., None]
    beta = beta * key_denom
    kf2 = kf / (key_denom + eps)
    denominator = jnp.sum(denom_acc * qf, axis=-1)[..., None]

    def step(W, xs):
        q_t, k_t, v_t, b_t = xs
        v_old = jnp.einsum("bhk,bhkv->bhv", k_t, W)
        v_new = b_t * (v_t - v_old)
        W = W + jnp.einsum("bhk,bhv->bhkv", k_t, v_new)
        out_t = jnp.einsum("bhk,bhkv->bhv", q_t, W)
        return W, out_t

    W0 = jnp.zeros((B, H, Dk, d_head), qf.dtype)
    xs = (qf.transpose(2, 0, 1, 3), kf2.transpose(2, 0, 1, 3),
          v.transpose(2, 0, 1, 3), beta.transpose(2, 0, 1, 3))
    _, outs = lax.scan(step, W0, xs)
    layer_out = outs.transpose(1, 2, 0, 3)
    layer_out = scale * layer_out / (denominator + eps)
    layer_out = layer_out.transpose(0, 2, 1, 3).reshape(bsz, slen, n_head * d_head)
    layer_out = layer_out.transpose(1, 0, 2)
    attn_out = jnp.einsum("lbk,dk->lbd", layer_out, params["w_o"])
    x = h + attn_out
    mu = jnp.mean(x, axis=-1, keepdims=True)
    var = jnp.mean(jnp.square(x - mu), axis=-1, keepdims=True)
    return (x - mu) / jnp.sqrt(var + 1e-5) * params["ln_g"] + params["ln_b"]


# ----------------------------------- main ----------------------------------- #

if __name__ == "__main__":
    n_head, d_head, d_model, n_roll = 4, 8, 32, 2
    slen, bsz = 16, 2
    eps = 1e-5

    key = jax.random.PRNGKey(0)
    kh, k1, k2 = jax.random.split(key, 3)
    h = jax.random.normal(kh, (slen, bsz, d_model), jnp.float32)
    params = {
        # PyTorch Linear weight layout: (out_features, in_features), no bias.
        "w_qkvb": jax.random.normal(
            k1, (n_head * (3 * d_head + 1), d_model), jnp.float32) * (d_model ** -0.5),
        "w_o": jax.random.normal(
            k2, (d_model, n_head * d_head), jnp.float32) * ((n_head * d_head) ** -0.5),
        "ln_g": jnp.ones((d_model,), jnp.float32),
        "ln_b": jnp.zeros((d_model,), jnp.float32),
    }

    common = dict(n_head=n_head, d_head=d_head, n_roll=n_roll, eps=eps)
    kp_bf16 = prepare_params(params, n_head=n_head, d_head=d_head,
                             matmul_dtype=jnp.bfloat16)
    kp_f32 = prepare_params(params, n_head=n_head, d_head=d_head,
                            matmul_dtype=jnp.float32)

    ref = jax.block_until_ready(forward_reference(h, params, **common))
    ref12 = jax.block_until_ready(forward_reference(h[:12], params, **common))

    checks = []
    # (a) bf16 MXU path, 2 chunks -> exercises the cross-chunk W / key-sum carry.
    out = jax.block_until_ready(forward_pallas(h, kp_bf16, chunk_size=8, **common))
    checks.append(("bf16 carry", out, ref, 1e-1))
    # (b) bf16 MXU path, single chunk of 16 -> exercises the blocked (I+B) solve.
    out = jax.block_until_ready(forward_pallas(h, kp_bf16, chunk_size=16, **common))
    checks.append(("bf16 blocked-solve", out, ref, 1e-1))
    # (c) f32 MXU path -> tight numerical check of the chunked formulation.
    out = jax.block_until_ready(forward_pallas(h, kp_f32, chunk_size=8, **common))
    checks.append(("f32", out, ref, 2e-2))
    # (d) slen not a multiple of the chunk -> exercises padding + masking.
    out = jax.block_until_ready(forward_pallas(h[:12], kp_bf16, chunk_size=8, **common))
    checks.append(("bf16 padded", out, ref12, 1e-1))

    ok = True
    for name, got, want, tol in checks:
        if got.shape != want.shape or not bool(jnp.all(jnp.isfinite(got))):
            ok = False
            print(f"MISMATCH {name}: bad shape or non-finite output")
            continue
        err = float(jnp.max(jnp.abs(got - want)))
        if err > tol:
            ok = False
            print(f"MISMATCH {name}: max_err={err:.3e} tol={tol:.1e}")
    if ok:
        print("KERNEL_OK")
</pallas_src>

<mosaic_0001>
module attributes {stable_mosaic.version = 11 : i64} {
  func.func @_fwm_kernel(%arg0: i32, %arg1: i32, %arg2: i32, %arg3: memref<8x32xbf16, #tpu.memory_space<vmem>>, %arg4: memref<1x32x8xbf16, #tpu.memory_space<vmem>>, %arg5: memref<1x32x8xbf16, #tpu.memory_space<vmem>>, %arg6: memref<1x32x8xbf16, #tpu.memory_space<vmem>>, %arg7: memref<1x32x1xbf16, #tpu.memory_space<vmem>>, %arg8: memref<1x8x8xbf16, #tpu.memory_space<vmem>>, %arg9: memref<8x32xf32, #tpu.memory_space<vmem>>, %arg10: memref<1x32xf32, #tpu.memory_space<vmem>>, %arg11: memref<8x8xf32, #tpu.memory_space<vmem>>, %arg12: memref<8x8xf32, #tpu.memory_space<vmem>>) attributes {dimension_semantics = [#tpu.dimension_semantics<parallel>, #tpu.dimension_semantics<parallel>, #tpu.dimension_semantics<arbitrary>], iteration_bounds = array<i64: 2, 4, 2>, scalar_prefetch = 0 : i64, scratch_operands = 4 : i64, tpu.core_type = #tpu.core_type<tc>, window_params = [{transform_indices = @transform_0, window_bounds = array<i64: 8, 32>}, {transform_indices = @transform_1, window_bounds = array<i64: 1, 32, 8>}, {transform_indices = @transform_2, window_bounds = array<i64: 1, 32, 8>}, {transform_indices = @transform_3, window_bounds = array<i64: 1, 32, 8>}, {transform_indices = @transform_4, window_bounds = array<i64: 1, 32, 1>}, {transform_indices = @transform_5, window_bounds = array<i64: 1, 8, 8>}]} {
    %c0_i32 = arith.constant 0 : i32
    %0 = arith.cmpi eq, %arg2, %c0_i32 : i32
    %1 = arith.extui %0 : i1 to i32
    %c0_i32_0 = arith.constant 0 : i32
    %2 = arith.cmpi ne, %1, %c0_i32_0 : i32
    scf.if %2 {
      %cst_72 = arith.constant 0.000000e+00 : f32
      %170 = vector.broadcast %cst_72 : f32 to vector<8x32xf32>
      %c0_73 = arith.constant 0 : index
      %c0_74 = arith.constant 0 : index
      %171 = vector.load %arg9[%c0_73, %c0_74] : memref<8x32xf32, #tpu.memory_space<vmem>>, vector<8x32xf32>
      tpu.vector_store %arg9[%c0_73, %c0_74], %170 {strides = array<i32>} : memref<8x32xf32, #tpu.memory_space<vmem>>, vector<8x32xf32>,
      %cst_75 = arith.constant 0.000000e+00 : f32
      %172 = vector.broadcast %cst_75 : f32 to vector<1x32xf32>
      %c0_76 = arith.constant 0 : index
      %c0_77 = arith.constant 0 : index
      %173 = vector.load %arg10[%c0_76, %c0_77] : memref<1x32xf32, #tpu.memory_space<vmem>>, vector<1x32xf32>
      tpu.vector_store %arg10[%c0_76, %c0_77], %172 {strides = array<i32>} : memref<1x32xf32, #tpu.memory_space<vmem>>, vector<1x32xf32>,
      %174 = tpu.iota {dimensions = array<i32: 0>} : vector<8x8xi32>
      %175 = tpu.iota {dimensions = array<i32: 1>} : vector<8x8xi32>
      %176 = arith.cmpi slt, %175, %174 : vector<8x8xi32>
      %177 = arith.extui %176 : vector<8x8xi1> to vector<8x8xi32>
      %178 = arith.sitofp %177 : vector<8x8xi32> to vector<8x8xf32>
      %c0_78 = arith.constant 0 : index
      %c0_79 = arith.constant 0 : index
      %179 = vector.load %arg11[%c0_78, %c0_79] : memref<8x8xf32, #tpu.memory_space<vmem>>, vector<8x8xf32>
      tpu.vector_store %arg11[%c0_78, %c0_79], %178 {strides = array<i32>} : memref<8x8xf32, #tpu.memory_space<vmem>>, vector<8x8xf32>,
      %180 = arith.cmpi sle, %175, %174 : vector<8x8xi32>
      %181 = arith.extui %180 : vector<8x8xi1> to vector<8x8xi32>
      %182 = arith.sitofp %181 : vector<8x8xi32> to vector<8x8xf32>
      %c0_80 = arith.constant 0 : index
      %c0_81 = arith.constant 0 : index
      %183 = vector.load %arg12[%c0_80, %c0_81] : memref<8x8xf32, #tpu.memory_space<vmem>>, vector<8x8xf32>
      tpu.vector_store %arg12[%c0_80, %c0_81], %182 {strides = array<i32>} : memref<8x8xf32, #tpu.memory_space<vmem>>, vector<8x8xf32>,
    } else {
    }
    %c0 = arith.constant 0 : index
    %c0_1 = arith.constant 0 : index
    %3 = vector.load %arg3[%c0, %c0_1] : memref<8x32xbf16, #tpu.memory_space<vmem>>, vector<8x32xbf16>
    %c0_2 = arith.constant 0 : index
    %c0_3 = arith.constant 0 : index
    %c0_4 = arith.constant 0 : index
    %4 = vector.load %arg4[%c0_2, %c0_3, %c0_4] : memref<1x32x8xbf16, #tpu.memory_space<vmem>>, vector<1x32x8xbf16>
    %5 = vector.shape_cast %4 : vector<1x32x8xbf16> to vector<32x8xbf16>
    %cst = arith.constant dense<0.000000e+00> : vector<8x8xf32>
    %6 = tpu.matmul %3, %5, %cst {dimension_numbers = #tpu.dot_dimension_numbers<[1], [0], [0], [1], [0, 0, 1, 1], [], []>} : vector<8x32xbf16>, vector<32x8xbf16>, vector<8x8xf32> -> vector<8x8xf32>
    %c0_5 = arith.constant 0 : index
    %c0_6 = arith.constant 0 : index
    %c0_7 = arith.constant 0 : index
    %7 = vector.load %arg5[%c0_5, %c0_6, %c0_7] : memref<1x32x8xbf16, #tpu.memory_space<vmem>>, vector<1x32x8xbf16>
    %8 = vector.shape_cast %7 : vector<1x32x8xbf16> to vector<32x8xbf16>
    %cst_8 = arith.constant dense<0.000000e+00> : vector<8x8xf32>
    %9 = tpu.matmul %3, %8, %cst_8 {dimension_numbers = #tpu.dot_dimension_numbers<[1], [0], [0], [1], [0, 0, 1, 1], [], []>} : vector<8x32xbf16>, vector<32x8xbf16>, vector<8x8xf32> -> vector<8x8xf32>
    %c0_9 = arith.constant 0 : index
    %c0_10 = arith.constant 0 : index
    %c0_11 = arith.constant 0 : index
    %10 = vector.load %arg6[%c0_9, %c0_10, %c0_11] : memref<1x32x8xbf16, #tpu.memory_space<vmem>>, vector<1x32x8xbf16>
    %11 = vector.shape_cast %10 : vector<1x32x8xbf16> to vector<32x8xbf16>
    %cst_12 = arith.constant dense<0.000000e+00> : vector<8x8xf32>
    %12 = tpu.matmul %3, %11, %cst_12 {dimension_numbers = #tpu.dot_dimension_numbers<[1], [0], [0], [1], [0, 0, 1, 1], [], []>} : vector<8x32xbf16>, vector<32x8xbf16>, vector<8x8xf32> -> vector<8x8xf32>
    %c0_13 = arith.constant 0 : index
    %c0_14 = arith.constant 0 : index
    %c0_15 = arith.constant 0 : index
    %13 = vector.load %arg7[%c0_13, %c0_14, %c0_15] : memref<1x32x1xbf16, #tpu.memory_space<vmem>>, vector<1x32x1xbf16>
    %14 = vector.shape_cast %13 : vector<1x32x1xbf16> to vector<32x1xbf16>
    %cst_16 = arith.constant dense<0.000000e+00> : vector<8x1xf32>
    %15 = tpu.matmul %3, %14, %cst_16 {dimension_numbers = #tpu.dot_dimension_numbers<[1], [0], [0], [1], [0, 0, 1, 1], [], []>} : vector<8x32xbf16>, vector<32x1xbf16>, vector<8x1xf32> -> vector<8x1xf32>
    %cst_17 = arith.constant 0.000000e+00 : f32
    %16 = vector.broadcast %cst_17 : f32 to vector<8x1xf32>
    %17 = arith.subf %16, %15 : vector<8x1xf32>
    %18 = math.exp %17 : vector<8x1xf32>
    %cst_18 = arith.constant 1.000000e+00 : f32
    %19 = vector.broadcast %cst_18 : f32 to vector<8x1xf32>
    %20 = arith.addf %19, %18 : vector<8x1xf32>
    %cst_19 = arith.constant 1.000000e+00 : f32
    %21 = vector.broadcast %cst_19 : f32 to vector<8x1xf32>
    %22 = arith.divf %21, %20 : vector<8x1xf32>
    %cst_20 = arith.constant 0.000000e+00 : f32
    %23 = vector.broadcast %cst_20 : f32 to vector<8x8xf32>
    %24 = arith.maximumf %6, %23 : vector<8x8xf32>
    %cst_21 = arith.constant 0.000000e+00 : f32
    %25 = vector.broadcast %cst_21 : f32 to vector<8x8xf32>
    %26 = arith.subf %25, %6 : vector<8x8xf32>
    %cst_22 = arith.constant 0.000000e+00 : f32
    %27 = vector.broadcast %cst_22 : f32 to vector<8x8xf32>
    %28 = arith.maximumf %26, %27 : vector<8x8xf32>
    %29 = tpu.concatenate %24, %28 in 1 : vector<8x8xf32>, vector<8x8xf32> -> vector<8x16xf32>
    %30 = vector.extract_strided_slice %29 {offsets = [0, 15], sizes = [8, 1], strides = [1, 1]} : vector<8x16xf32> to vector<8x1xf32>
    %31 = vector.extract_strided_slice %29 {offsets = [0, 0], sizes = [8, 15], strides = [1, 1]} : vector<8x16xf32> to vector<8x15xf32>
    %32 = tpu.concatenate %30, %31 in 1 : vector<8x1xf32>, vector<8x15xf32> -> vector<8x16xf32>
    %33 = arith.mulf %29, %32 : vector<8x16xf32>
    %34 = vector.extract_strided_slice %29 {offsets = [0, 14], sizes = [8, 2], strides = [1, 1]} : vector<8x16xf32> to vector<8x2xf32>
    %35 = vector.extract_strided_slice %29 {offsets = [0, 0], sizes = [8, 14], strides = [1, 1]} : vector<8x16xf32> to vector<8x14xf32>
    %36 = tpu.concatenate %34, %35 in 1 : vector<8x2xf32>, vector<8x14xf32> -> vector<8x16xf32>
    %37 = arith.mulf %29, %36 : vector<8x16xf32>
    %38 = tpu.concatenate %33, %37 in 1 : vector<8x16xf32>, vector<8x16xf32> -> vector<8x32xf32>
    %cst_23 = arith.constant dense<0.000000e+00> : vector<8xf32>
    %39 = vector.multi_reduction <add>, %38, %cst_23 [1] : vector<8x32xf32> to vector<8xf32>
    %40 = vector.shape_cast %39 : vector<8xf32> to vector<8x1xf32>
    %cst_24 = arith.constant 0.000000e+00 : f32
    %41 = vector.broadcast %cst_24 : f32 to vector<8x1xf32>
    %42 = arith.cmpf oeq, %40, %41 : vector<8x1xf32>
    %cst_25 = arith.constant 1.000000e+00 : f32
    %43 = vector.broadcast %cst_25 : f32 to vector<8x1xf32>
    %44 = arith.select %42, %43, %40 : vector<8x1xi1>, vector<8x1xf32>
    %45 = vector.broadcast %44 : vector<8x1xf32> to vector<8x32xf32>
    %46 = arith.divf %38, %45 : vector<8x32xf32>
    %cst_26 = arith.constant 0.000000e+00 : f32
    %47 = vector.broadcast %cst_26 : f32 to vector<8x8xf32>
    %48 = arith.maximumf %9, %47 : vector<8x8xf32>
    %cst_27 = arith.constant 0.000000e+00 : f32
    %49 = vector.broadcast %cst_27 : f32 to vector<8x8xf32>
    %50 = arith.subf %49, %9 : vector<8x8xf32>
    %cst_28 = arith.constant 0.000000e+00 : f32
    %51 = vector.broadcast %cst_28 : f32 to vector<8x8xf32>
    %52 = arith.maximumf %50, %51 : vector<8x8xf32>
    %53 = tpu.concatenate %48, %52 in 1 : vector<8x8xf32>, vector<8x8xf32> -> vector<8x16xf32>
    %54 = vector.extract_strided_slice %53 {offsets = [0, 15], sizes = [8, 1], strides = [1, 1]} : vector<8x16xf32> to vector<8x1xf32>
    %55 = vector.extract_strided_slice %53 {offsets = [0, 0], sizes = [8, 15], strides = [1, 1]} : vector<8x16xf32> to vector<8x15xf32>
    %56 = tpu.concatenate %54, %55 in 1 : vector<8x1xf32>, vector<8x15xf32> -> vector<8x16xf32>
    %57 = arith.mulf %53, %56 : vector<8x16xf32>
    %58 = vector.extract_strided_slice %53 {offsets = [0, 14], sizes = [8, 2], strides = [1, 1]} : vector<8x16xf32> to vector<8x2xf32>
    %59 = vector.extract_strided_slice %53 {offsets = [0, 0], sizes = [8, 14], strides = [1, 1]} : vector<8x16xf32> to vector<8x14xf32>
    %60 = tpu.concatenate %58, %59 in 1 : vector<8x2xf32>, vector<8x14xf32> -> vector<8x16xf32>
    %61 = arith.mulf %53, %60 : vector<8x16xf32>
    %62 = tpu.concatenate %57, %61 in 1 : vector<8x16xf32>, vector<8x16xf32> -> vector<8x32xf32>
    %cst_29 = arith.constant dense<0.000000e+00> : vector<8xf32>
    %63 = vector.multi_reduction <add>, %62, %cst_29 [1] : vector<8x32xf32> to vector<8xf32>
    %64 = vector.shape_cast %63 : vector<8xf32> to vector<8x1xf32>
    %cst_30 = arith.constant 0.000000e+00 : f32
    %65 = vector.broadcast %cst_30 : f32 to vector<8x1xf32>
    %66 = arith.cmpf oeq, %64, %65 : vector<8x1xf32>
    %cst_31 = arith.constant 1.000000e+00 : f32
    %67 = vector.broadcast %cst_31 : f32 to vector<8x1xf32>
    %68 = arith.select %66, %67, %64 : vector<8x1xi1>, vector<8x1xf32>
    %69 = vector.broadcast %68 : vector<8x1xf32> to vector<8x32xf32>
    %70 = arith.divf %62, %69 : vector<8x32xf32>
    %c0_32 = arith.constant 0 : index
    %c0_33 = arith.constant 0 : index
    %71 = vector.load %arg9[%c0_32, %c0_33] : memref<8x32xf32, #tpu.memory_space<vmem>>, vector<8x32xf32>
    %c0_34 = arith.constant 0 : index
    %c0_35 = arith.constant 0 : index
    %72 = vector.load %arg10[%c0_34, %c0_35] : memref<1x32xf32, #tpu.memory_space<vmem>>, vector<1x32xf32>
    %c0_36 = arith.constant 0 : index
    %c0_37 = arith.constant 0 : index
    %73 = vector.load %arg11[%c0_36, %c0_37] : memref<8x8xf32, #tpu.memory_space<vmem>>, vector<8x8xf32>
    %c0_38 = arith.constant 0 : index
    %c0_39 = arith.constant 0 : index
    %74 = vector.load %arg12[%c0_38, %c0_39] : memref<8x8xf32, #tpu.memory_space<vmem>>, vector<8x8xf32>
    %c8_i32 = arith.constant 8 : i32
    %75 = arith.muli %arg2, %c8_i32 : i32
    %76 = tpu.iota {dimensions = array<i32: 0>} : vector<8x1xi32>
    %77 = vector.broadcast %75 : i32 to vector<8x1xi32>
    %78 = arith.addi %77, %76 : vector<8x1xi32>
    %79 = arith.truncf %70 : vector<8x32xf32> to vector<8x32xbf16>
    %80 = arith.truncf %70 : vector<8x32xf32> to vector<8x32xbf16>
    %cst_40 = arith.constant dense<0.000000e+00> : vector<8x8xf32>
    %81 = tpu.matmul %79, %80, %cst_40 {dimension_numbers = #tpu.dot_dimension_numbers<[1], [1], [0], [0], [0, 0, 1, 0], [], []>} : vector<8x32xbf16>, vector<8x32xbf16>, vector<8x8xf32> -> vector<8x8xf32>
    %82 = arith.truncf %46 : vector<8x32xf32> to vector<8x32xbf16>
    %83 = arith.truncf %70 : vector<8x32xf32> to vector<8x32xbf16>
    %cst_41 = arith.constant dense<0.000000e+00> : vector<8x8xf32>
    %84 = tpu.matmul %82, %83, %cst_41 {dimension_numbers = #tpu.dot_dimension_numbers<[1], [1], [0], [0], [0, 0, 1, 0], [], []>} : vector<8x32xbf16>, vector<8x32xbf16>, vector<8x8xf32> -> vector<8x8xf32>
    %85 = arith.mulf %81, %73 : vector<8x8xf32>
    %cst_42 = arith.constant dense<0.000000e+00> : vector<8xf32>
    %86 = vector.multi_reduction <add>, %85, %cst_42 [1] : vector<8x8xf32> to vector<8xf32>
    %87 = vector.shape_cast %86 : vector<8xf32> to vector<8x1xf32>
    %88 = vector.broadcast %72 : vector<1x32xf32> to vector<8x32xf32>
    %89 = arith.mulf %70, %88 : vector<8x32xf32>
    %cst_43 = arith.constant dense<0.000000e+00> : vector<8xf32>
    %90 = vector.multi_reduction <add>, %89, %cst_43 [1] : vector<8x32xf32> to vector<8xf32>
    %91 = vector.shape_cast %90 : vector<8xf32> to vector<8x1xf32>
    %92 = arith.addf %87, %91 : vector<8x1xf32>
    %c0_i32_44 = arith.constant 0 : i32
    %93 = vector.broadcast %c0_i32_44 : i32 to vector<8x1xi32>
    %94 = arith.cmpi eq, %78, %93 : vector<8x1xi32>
    %cst_45 = arith.constant 1.000000e+00 : f32
    %95 = vector.broadcast %cst_45 : f32 to vector<8x1xf32>
    %96 = arith.select %94, %95, %92 : vector<8x1xi1>, vector<8x1xf32>
    %97 = arith.mulf %84, %74 : vector<8x8xf32>
    %cst_46 = arith.constant dense<0.000000e+00> : vector<8xf32>
    %98 = vector.multi_reduction <add>, %97, %cst_46 [1] : vector<8x8xf32> to vector<8xf32>
    %99 = vector.shape_cast %98 : vector<8xf32> to vector<8x1xf32>
    %100 = vector.broadcast %72 : vector<1x32xf32> to vector<8x32xf32>
    %101 = arith.mulf %46, %100 : vector<8x32xf32>
    %cst_47 = arith.constant dense<0.000000e+00> : vector<8xf32>
    %102 = vector.multi_reduction <add>, %101, %cst_47 [1] : vector<8x32xf32> to vector<8xf32>
    %103 = vector.shape_cast %102 : vector<8xf32> to vector<8x1xf32>
    %104 = arith.addf %99, %103 : vector<8x1xf32>
    %cst_48 = arith.constant 9.99999974E-6 : f32
    %105 = vector.broadcast %cst_48 : f32 to vector<8x1xf32>
    %106 = arith.addf %96, %105 : vector<8x1xf32>
    %cst_49 = arith.constant 1.000000e+00 : f32
    %107 = vector.broadcast %cst_49 : f32 to vector<8x1xf32>
    %108 = arith.divf %107, %106 : vector<8x1xf32>
    %109 = arith.mulf %22, %96 : vector<8x1xf32>
    %110 = vector.broadcast %108 : vector<8x1xf32> to vector<8x32xf32>
    %111 = arith.mulf %70, %110 : vector<8x32xf32>
    %112 = arith.truncf %111 : vector<8x32xf32> to vector<8x32xbf16>
    %113 = arith.truncf %111 : vector<8x32xf32> to vector<8x32xbf16>
    %cst_50 = arith.constant dense<0.000000e+00> : vector<8x8xf32>
    %114 = tpu.matmul %112, %113, %cst_50 {dimension_numbers = #tpu.dot_dimension_numbers<[1], [1], [0], [0], [0, 0, 1, 0], [], []>} : vector<8x32xbf16>, vector<8x32xbf16>, vector<8x8xf32> -> vector<8x8xf32>
    %115 = arith.mulf %114, %73 : vector<8x8xf32>
    %116 = vector.broadcast %109 : vector<8x1xf32> to vector<8x8xf32>
    %117 = arith.mulf %116, %115 : vector<8x8xf32>
    %118 = arith.truncf %111 : vector<8x32xf32> to vector<8x32xbf16>
    %119 = arith.truncf %71 : vector<8x32xf32> to vector<8x32xbf16>
    %cst_51 = arith.constant dense<0.000000e+00> : vector<8x8xf32>
    %120 = tpu.matmul %118, %119, %cst_51 {dimension_numbers = #tpu.dot_dimension_numbers<[1], [1], [0], [0], [0, 0, 1, 0], [], []>} : vector<8x32xbf16>, vector<8x32xbf16>, vector<8x8xf32> -> vector<8x8xf32>
    %121 = arith.subf %12, %120 : vector<8x8xf32>
    %122 = vector.broadcast %109 : vector<8x1xf32> to vector<8x8xf32>
    %123 = arith.mulf %122, %121 : vector<8x8xf32>
    %124 = tpu.iota {dimensions = array<i32: 0>} : vector<8x8xi32>
    %125 = tpu.iota {dimensions = array<i32: 1>} : vector<8x8xi32>
    %126 = arith.cmpi eq, %124, %125 : vector<8x8xi32>
    %127 = arith.extui %126 : vector<8x8xi1> to vector<8x8xi32>
    %128 = arith.sitofp %127 : vector<8x8xi32> to vector<8x8xf32>
    %cst_52 = arith.constant 0.000000e+00 : f32
    %129 = vector.broadcast %cst_52 : f32 to vector<8x8xf32>
    %130 = arith.subf %129, %117 : vector<8x8xf32>
    %131 = arith.addf %128, %130 : vector<8x8xf32>
    %cst_53 = arith.constant dense<0.000000e+00> : vector<8x8xf32>
    %132 = tpu.matmul %130, %130, %cst_53 {dimension_numbers = #tpu.dot_dimension_numbers<[1], [0], [0], [1], [0, 0, 1, 1], [], []>} : vector<8x8xf32>, vector<8x8xf32>, vector<8x8xf32> -> vector<8x8xf32>
    %cst_54 = arith.constant dense<0.000000e+00> : vector<8x8xf32>
    %133 = tpu.matmul %131, %132, %cst_54 {dimension_numbers = #tpu.dot_dimension_numbers<[1], [0], [0], [1], [0, 0, 1, 1], [], []>} : vector<8x8xf32>, vector<8x8xf32>, vector<8x8xf32> -> vector<8x8xf32>
    %134 = arith.addf %131, %133 : vector<8x8xf32>
    %cst_55 = arith.constant dense<0.000000e+00> : vector<8x8xf32>
    %135 = tpu.matmul %132, %132, %cst_55 {dimension_numbers = #tpu.dot_dimension_numbers<[1], [0], [0], [1], [0, 0, 1, 1], [], []>} : vector<8x8xf32>, vector<8x8xf32>, vector<8x8xf32> -> vector<8x8xf32>
    %cst_56 = arith.constant dense<0.000000e+00> : vector<8x8xf32>
    %136 = tpu.matmul %134, %135, %cst_56 {dimension_numbers = #tpu.dot_dimension_numbers<[1], [0], [0], [1], [0, 0, 1, 1], [], []>} : vector<8x8xf32>, vector<8x8xf32>, vector<8x8xf32> -> vector<8x8xf32>
    %137 = arith.addf %134, %136 : vector<8x8xf32>
    %cst_57 = arith.constant dense<0.000000e+00> : vector<8x8xf32>
    %138 = tpu.matmul %137, %123, %cst_57 {dimension_numbers = #tpu.dot_dimension_numbers<[1], [0], [0], [1], [0, 0, 1, 1], [], []>} : vector<8x8xf32>, vector<8x8xf32>, vector<8x8xf32> -> vector<8x8xf32>
    %139 = arith.truncf %46 : vector<8x32xf32> to vector<8x32xbf16>
    %140 = arith.truncf %111 : vector<8x32xf32> to vector<8x32xbf16>
    %cst_58 = arith.constant dense<0.000000e+00> : vector<8x8xf32>
    %141 = tpu.matmul %139, %140, %cst_58 {dimension_numbers = #tpu.dot_dimension_numbers<[1], [1], [0], [0], [0, 0, 1, 0], [], []>} : vector<8x32xbf16>, vector<8x32xbf16>, vector<8x8xf32> -> vector<8x8xf32>
    %142 = arith.truncf %46 : vector<8x32xf32> to vector<8x32xbf16>
    %143 = arith.truncf %71 : vector<8x32xf32> to vector<8x32xbf16>
    %cst_59 = arith.constant dense<0.000000e+00> : vector<8x8xf32>
    %144 = tpu.matmul %142, %143, %cst_59 {dimension_numbers = #tpu.dot_dimension_numbers<[1], [1], [0], [0], [0, 0, 1, 0], [], []>} : vector<8x32xbf16>, vector<8x32xbf16>, vector<8x8xf32> -> vector<8x8xf32>
    %145 = arith.mulf %141, %74 : vector<8x8xf32>
    %146 = arith.truncf %145 : vector<8x8xf32> to vector<8x8xbf16>
    %147 = arith.truncf %138 : vector<8x8xf32> to vector<8x8xbf16>
    %cst_60 = arith.constant dense<0.000000e+00> : vector<8x8xf32>
    %148 = tpu.matmul %146, %147, %cst_60 {dimension_numbers = #tpu.dot_dimension_numbers<[1], [0], [0], [1], [0, 0, 1, 1], [], []>} : vector<8x8xbf16>, vector<8x8xbf16>, vector<8x8xf32> -> vector<8x8xf32>
    %149 = arith.addf %144, %148 : vector<8x8xf32>
    %cst_61 = arith.constant 0.353553385 : f32
    %150 = vector.broadcast %cst_61 : f32 to vector<8x8xf32>
    %151 = arith.mulf %150, %149 : vector<8x8xf32>
    %cst_62 = arith.constant 9.99999974E-6 : f32
    %152 = vector.broadcast %cst_62 : f32 to vector<8x1xf32>
    %153 = arith.addf %104, %152 : vector<8x1xf32>
    %154 = tpu.reciprocal %153 {approx = true} : vector<8x1xf32> -> vector<8x1xf32>
    %155 = vector.broadcast %154 : vector<8x1xf32> to vector<8x8xf32>
    %156 = arith.mulf %151, %155 : vector<8x8xf32>
    %157 = arith.truncf %156 : vector<8x8xf32> to vector<8x8xbf16>
    %c0_63 = arith.constant 0 : index
    %c0_64 = arith.constant 0 : index
    %c0_65 = arith.constant 0 : index
    %158 = vector.load %arg8[%c0_63, %c0_64, %c0_65] : memref<1x8x8xbf16, #tpu.memory_space<vmem>>, vector<1x8x8xbf16>
    %159 = vector.shape_cast %158 : vector<1x8x8xbf16> to vector<8x8xbf16>
    %160 = vector.shape_cast %157 : vector<8x8xbf16> to vector<1x8x8xbf16>
    tpu.vector_store %arg8[%c0_63, %c0_64, %c0_65], %160 {strides = array<i32>} : memref<1x8x8xbf16, #tpu.memory_space<vmem>>, vector<1x8x8xbf16>,
    %161 = arith.truncf %138 : vector<8x8xf32> to vector<8x8xbf16>
    %162 = arith.truncf %111 : vector<8x32xf32> to vector<8x32xbf16>
    %cst_66 = arith.constant dense<0.000000e+00> : vector<8x32xf32>
    %163 = tpu.matmul %161, %162, %cst_66 {dimension_numbers = #tpu.dot_dimension_numbers<[0], [0], [1], [1], [0, 1, 1, 1], [], []>} : vector<8x8xbf16>, vector<8x32xbf16>, vector<8x32xf32> -> vector<8x32xf32>
    %164 = arith.addf %71, %163 : vector<8x32xf32>
    %c0_67 = arith.constant 0 : index
    %c0_68 = arith.constant 0 : index
    %165 = vector.load %arg9[%c0_67, %c0_68] : memref<8x32xf32, #tpu.memory_space<vmem>>, vector<8x32xf32>
    tpu.vector_store %arg9[%c0_67, %c0_68], %164 {strides = array<i32>} : memref<8x32xf32, #tpu.memory_space<vmem>>, vector<8x32xf32>,
    %cst_69 = arith.constant dense<0.000000e+00> : vector<32xf32>
    %166 = vector.multi_reduction <add>, %70, %cst_69 [0] : vector<8x32xf32> to vector<32xf32>
    %167 = vector.shape_cast %166 : vector<32xf32> to vector<1x32xf32>
    %168 = arith.addf %72, %167 : vector<1x32xf32>
    %c0_70 = arith.constant 0 : index
    %c0_71 = arith.constant 0 : index
    %169 = vector.load %arg10[%c0_70, %c0_71] : memref<1x32xf32, #tpu.memory_space<vmem>>, vector<1x32xf32>
    tpu.vector_store %arg10[%c0_70, %c0_71], %168 {strides = array<i32>} : memref<1x32xf32, #tpu.memory_space<vmem>>, vector<1x32xf32>,
    return
  }
  func.func @transform_0(%arg0: i32, %arg1: i32, %arg2: i32) -> (i32, i32) {
    %c2_i32 = arith.constant 2 : i32
    %0 = arith.muli %arg0, %c2_i32 : i32
    %1 = arith.addi %0, %arg2 : i32
    %c0_i32 = arith.constant 0 : i32
    %c0_i32_0 = arith.constant 0 : i32
    return %1, %c0_i32 : i32, i32
  }
  func.func @transform_1(%arg0: i32, %arg1: i32, %arg2: i32) -> (i32, i32, i32) {
    %c0_i32 = arith.constant 0 : i32
    %c0_i32_0 = arith.constant 0 : i32
    %c0_i32_1 = arith.constant 0 : i32
    return %arg1, %c0_i32, %c0_i32_0 : i32, i32, i32
  }
  func.func @transform_2(%arg0: i32, %arg1: i32, %arg2: i32) -> (i32, i32, i32) {
    %c0_i32 = arith.constant 0 : i32
    %c0_i32_0 = arith.constant 0 : i32
    %c0_i32_1 = arith.constant 0 : i32
    return %arg1, %c0_i32, %c0_i32_0 : i32, i32, i32
  }
  func.func @transform_3(%arg0: i32, %arg1: i32, %arg2: i32) -> (i32, i32, i32) {
    %c0_i32 = arith.constant 0 : i32
    %c0_i32_0 = arith.constant 0 : i32
    %c0_i32_1 = arith.constant 0 : i32
    return %arg1, %c0_i32, %c0_i32_0 : i32, i32, i32
  }
  func.func @transform_4(%arg0: i32, %arg1: i32, %arg2: i32) -> (i32, i32, i32) {
    %c0_i32 = arith.constant 0 : i32
    %c0_i32_0 = arith.constant 0 : i32
    %c0_i32_1 = arith.constant 0 : i32
    return %arg1, %c0_i32, %c0_i32_0 : i32, i32, i32
  }
  func.func @transform_5(%arg0: i32, %arg1: i32, %arg2: i32) -> (i32, i32, i32) {
    %c2_i32 = arith.constant 2 : i32
    %0 = arith.muli %arg0, %c2_i32 : i32
    %1 = arith.addi %0, %arg2 : i32
    %c0_i32 = arith.constant 0 : i32
    %c0_i32_0 = arith.constant 0 : i32
    return %arg1, %1, %c0_i32 : i32, i32, i32
  }
}

</mosaic_0001>

<bundles_post_ra>
// kernel: tpu_custom_call.1
= control target key start
LH: loop header
LB: loop body
LE: loop exit
PB: predicated region body
PF: predicated region fallthrough
CT: control target
= control target key end

     0   :  { %s2027_s18 = smov 0   ;;  %s2029_s19 = smov 0   ;;  %s2300_s0 = inlined_call_operand.vmem [shape: bf16[32,32], index: 0, kind: input, shape index: {}]   ;;  %s2301_s1 = inlined_call_operand.vmem [shape: bf16[4,32,8], index: 1, kind: input, shape index: {}]   ;;  %s2302_s2 = inlined_call_operand.vmem [shape: bf16[4,32,8], index: 2, kind: input, shape index: {}]   ;;  %s2303_s3 = inlined_call_operand.vmem [shape: bf16[4,32,8], index: 3, kind: input, shape index: {}]   ;;  %s2304_s4 = inlined_call_operand.vmem [shape: bf16[4,32,1], index: 4, kind: input, shape index: {}]   ;;  %s2305_s5 = inlined_call_operand.vmem [shape: bf16[4,32,8], index: 5, kind: output, shape index: {}]  }
   0x1   :  { %2306 = sst [smem:[#allocation8_spill]] %s2301_s1  ;;  %s2031_s20 = smov 0  }
   0x2   :  { %s2033_s21 = smov 0   ;;  %s2035_s22 = smov 0  }
   0x3   :  { %s2037_s23 = smov 0   ;;  %s2039_s24 = smov 0  }
   0x4 LB: > { %s27_s25 = sadd.s32 1, %s1973_s21  ;;  %s30_s26 = sadd.s32 1, %s1977_s22  ;;  %s1985_s24 = sphi %s2039_s24, %s15_s24   ;;  %s1981_s23 = sphi %s2037_s23, %s2317_s23   ;;  %s1977_s22 = sphi %s2035_s22, %s2316_s22   ;;  %s1973_s21 = sphi %s2033_s21, %s2315_s21   ;;  %s1969_s20 = sphi %s2031_s20, %s2314_s20   ;;  %s1965_s19 = sphi %s2029_s19, %s2313_s19   ;;  %s1961_s18 = sphi %s2027_s18, %s2312_s18  }
   0x5   : > { %p28_p0 = scmp.ge.s32.totalorder %s27_s25, 2  ;;  %p1646_p1 = scmp.ge.s32.totalorder %s1985_s24, 1 }
   0x6   : > { %p259_p2 = scmp.lt.s32.totalorder %s1985_s24, 17  ;;  %s34_s27 = sadd.s32 1, %s1981_s23 }
   0x7   : > { %s2319_s25 = smov (%p28_p0, %s27_s25), 0  ;;  %s2321_s26 = smov (!%p28_p0, %s30_s26), %s1977_s22 }
   0x8   : > { %p260_p3 = pnand %p1646_p1, %p259_p2  ;;  %p32_p4 = scmp.ge.s32.totalorder %s2321_s26, 4 }
   0x9   : > { %s1647_s28 = sshll.u32 (!%p260_p3), %s1969_s20, 1  ;;  %p321_p6 = scmp.lt.s32.totalorder (!%p260_p3), %s1965_s19, 3 }
   0xa   : > { %s2323_s26 = smov (%p32_p4, %s2321_s26), 0  ;;  %s2325_s27 = smov (!%p32_p4, %s34_s27), %s1981_s23 }
   0xb   : > { %2307 = sst [smem:[#allocation6_spill]] %s2323_s26  ;;  %p36_p5 = scmp.ge.s32.totalorder %s2325_s27, 2 }
   0xc   : > { %263 = sbr.rel (%p260_p3) target bundleno = 2551 (0x9f7), region = 40  ;;  %s314_s29 = sadd.s32 (!%p260_p3), %s1961_s18, %s1647_s28 }
   0xd   : > { %s2327_s27 = smov (%p36_p5, %s2325_s27), 0  ;;  %p315_p7 = scmp.lt.s32.totalorder (!%p260_p3), %s314_s29, 3 }
   0xe   : > { %2308 = sst [smem:[#allocation7_spill]] %s2327_s27  ;;  %s2309_s1 = sld [smem:[#allocation8_spill]] (!%p260_p3) }
   0xf   : > { %p1660_p8 = scmp.ne.s32.totalorder (!%p260_p3), %s1961_s18, 0 }
  0x13   : > { %s2329_s19 = smov (!%p321_p6, %s1965_s19), 3  ;;  %s2331_s29 = smov (!%p315_p7, %s314_s29), 3 }
  0x14   : > { %s1692_s30 = sshll.u32 %s2329_s19, 4  ;;  %s1658_s6 = sshll.u32 %s2329_s19, 2  ;;  %vm358_vm0 = vcmask (!%p1660_p8), 261120   ;;  %vm360_vm1 = vcmask (!%p1660_p8), 253952   ;;  %v362_v0 = vlaneseq (!%p1660_p8)  ;;  %v1987_v1 = vmov (!%p1660_p8), 0.0  }
  0x15   : > { %s1648_s7 = sshll.u32 %s2331_s29, 2  ;;  %s2075_s10 = scalar_lea.vmem %s2309_s1, %s1692_s30  ;;  %359 = vst.msk [vmem:[#allocation2] sm:$0xff] (!%p1660_p8), %vm358_vm0, %v1987_v1  ;;  %vm369_vm2 = vcmask (!%p1660_p8), 64512  }
  0x16   : > { %s2080_s13 = scalar_lea.vmem %s2300_s0, %s1648_s7  ;;  %s330_s16 = scalar_lea.vmem %s2302_s2, %s1692_s30  ;;  %361 = vst.msk [vmem:[#allocation3] sm:$0x1] (!%p1660_p8), %vm360_vm1, %v1987_v1  ;;  %v363_v2 = vshrl.u32 (!%p1660_p8), %v362_v0, 7  ;;  %v365_v3 = vand.u32 (!%p1660_p8), 127, %v362_v0 }
  0x17   : > { %s2088_s28 = scalar_lea.vmem %s2303_s3, %s1692_s30  ;;  %s2093_s8 = scalar_lea.vmem %s2304_s4, %s1692_s30 }
  0x18   : > { %s348_s9 = sadd.s32 %s1658_s6, %s2331_s29  ;;  %357 = sbr.rel (%p1660_p8) target bundleno = 31 (0x1f), region = 44  ;;  %vm366_vm3 = vcmp.lt.s32.totalorder (!%p1660_p8), %v365_v3, %v363_v2  ;;  %vm371_vm4 = vcmp.le.s32.totalorder (!%p1660_p8), %v365_v3, %v363_v2 }
  0x19   : > { %s1659_s1 = sshll.u32 %s348_s9, 2  ;;  %v1661_v4 = vsel (!%p1660_p8), %vm366_vm3, 1.0, %v1987_v1  ;;  %v1662_v5 = vsel (!%p1660_p8), %vm371_vm4, 1.0, %v1987_v1 }
  0x1a   : > { %s2098_s7 = scalar_lea.vmem %s2305_s5, %s1659_s1  ;;  %370 = vst.msk [vmem:[#allocation4] sm:$0xff] (!%p1660_p8), %vm369_vm2, %v1661_v4  ;;  %374 = vst.msk [vmem:[#allocation5] sm:$0xff] (!%p1660_p8), %vm369_vm2, %v1662_v5 }
  0x1f PF: > { %v1911_v6 = vld [vmem:[%s330_s16] sm:$0xff]   ;;  %v1988_v7 = vmov 0.0   ;;  %v1912_v8 = vld [vmem:[%s330_s16 + $0x8] sm:$0xff]   ;;  %vm1989_vm5 = vmmov 0   ;;  %vm392_vm6 = vcmask 261120   ;;  %s1990_s1 = smov 8   ;;  %v693_v41 = vlaneseq }
  0x20   : > { %1742 = vmatprep.subr.bf16.mxu1 %v1988_v7  ;;  %1734 = vmatprep.subr.bf16.mxu0 %v1988_v7  ;;  %v2109_v9 = vld [vmem:[%s2080_s13] sm:$0xf]  ;;  %vm617_vm7 = vcmask 64512   ;;  %s1991_s26 = smov 2   ;;  %s1992_s27 = smov 114   ;;  %v1914_v20 = vld [vmem:[%s2075_s10 + $0x8] sm:$0xff]  }
  0x21   : > { %1743 = vmatpush3.bf16.msra.mxu1 %v1911_v6  ;;  %1746 = vmatprep.mubr.msk.bf16.mxu1 %vm1989_vm5, %v1988_v7  ;;  %s1993_s29 = smov 113   ;;  %s1994_s30 = smov 1   ;;  %v1913_v19 = vld [vmem:[%s2075_s10] sm:$0xff]   ;;  %vm635_vm8 = vcmask 15360   ;;  %vm626_vm9 = vcmask 7168   ;;  %vm642_vm10 = vcmask 130048  }
  0x22   : > { %1744 = vmatprep.subr.bf16.mxu1 %v1988_v7  ;;  %1738 = vmatprep.mubr.msk.bf16.mxu0 %vm1989_vm5, %v1988_v7  ;;  %s1995_s6 = smov 16   ;;  %v1915_v32 = vld [vmem:[%s2088_s28] sm:$0xff]   ;;  %v1917_v34 = vld [vmem:[%s2088_s28 + $0x8] sm:$0xff]   ;;  %v2152_v43 = vshrl.u32 %v693_v41, 7  ;;  %vm1495_vm12 = vcmask 253952   ;;  %s1675_s10 = sshll.u32 %s1961_s18, 3 }
  0x23   : > { %1735 = vmatpush3.bf16.msra.mxu0 %v1913_v19  ;;  %v1916_v33 = vld [vmem:[%s2093_s8] sm:$0xff]   ;;  %v1918_v35 = vld [vmem:[%s2093_s8 + $0x8] sm:$0xff]   ;;  %v1996_v19 = vmov 0   ;;  %vm1333_vm0 = vcmask 1043456   ;;  %vm1422_vm1 = vcmask 60416  }
  0x24   : > { %1736 = vmatprep.subr.bf16.mxu0 %v1988_v7  ;;  %v792_v44 = vsub.s32 0, %v2152_v43  ;;  %v689_v45 = vld [vmem:[#allocation3] sm:$0x1]  ;;  %1909 = vset.pattern.permute.xlu1 %v1996_v19 }
  0x25   : > { %1745 = vmatpush3.bf16.msra.mxu1 %v1912_v8  ;;  %1910 = vset.pattern.permute.xlu0 %v1996_v19 }
  0x26   : > { %1758 = vmatprep.subr.bf16.mxu1 %v1988_v7  ;;  %v2155_v46 = vrot.slane %v689_v45, %v792_v44 }
  0x27   : > { %1737 = vmatpush3.bf16.msra.mxu0 %v1914_v20 }
  0x28   : > { %1747 = vmatmul.mubr.msk.bf16.vlgmr.msra.gmra.mrb[0].mxu1 %vm392_vm6, %v2109_v9  ;;  %1750 = vmatprep.subr.bf16.mxu0 %v1988_v7 }
  0x29   : > { %1762 = vmatprep.mubr.msk.bf16.mxu1 %vm1989_vm5, %v1988_v7  ;;  %1759 = vmatpush3.bf16.msra.mxu1 %v1916_v33 }
  0x2a   : > { %1739 = vmatmul.mubr.msk.bf16.vlgmr.msra.gmra.mrb[0].mxu0 %vm392_vm6, %v2109_v9  ;;  %1760 = vmatprep.subr.bf16.mxu1 %v1988_v7 }
  0x2b   : > { %1754 = vmatprep.mubr.msk.bf16.mxu0 %vm1989_vm5, %v1988_v7  ;;  %1751 = vmatpush3.bf16.msra.mxu0 %v1915_v32 }
  0x2c   : > { %1752 = vmatprep.subr.bf16.mxu0 %v1988_v7 }
  0x2d   : > { %1761 = vmatpush3.bf16.msra.mxu1 %v1918_v35 }
  0x2e   : > { %1772 = vmatprep.subr.bf16.mxu1 %v1988_v7 }
  0x2f   : > { %1753 = vmatpush3.bf16.msra.mxu0 %v1917_v34 }
  0x30   : > { %1766 = vmatprep.subr.bf16.mxu0 %v1988_v7  ;;  %1763 = vmatmul.mubr.msk.bf16.vlgmr.msra.gmra.mrb[4].mxu1 %vm392_vm6, %v2109_v9 }
  0x31   : > { %1774 = vmatprep.mubr.msk.bf16.mxu1 %vm1989_vm5, %v1988_v7 }
  0x32   : > { %1755 = vmatmul.mubr.msk.bf16.vlgmr.msra.gmra.mrb[4].mxu0 %vm392_vm6, %v2109_v9 }
  0x33   : > { %1768 = vmatprep.mubr.msk.bf16.mxu0 %vm1989_vm5, %v1988_v7 }
  0xfb   : > { %v486_v10 = vpop.f32.mrb[0].mxu1 }
  0xfc   : > { %v652_v11 = vsub.f32 0.0, %v486_v10  ;;  %v1748_v12 = vpop.f32.mrb[1].mxu1  ;;  %v651_v16 = vmax.f32 %v486_v10, 0.0 }
  0xfd   : > { %v489_v13 = vpop.f32.mrb[2].mxu1  ;;  %v430_v36 = vpop.f32.mrb[0].mxu0  ;;  %v690_v12 = vld [vmem:[#allocation4] sm:$0xff] }
  0xfe   : > { %v1749_v14 = vpop.f32.mrb[3].mxu1  ;;  %v653_v15 = vmax.f32 %v652_v11, 0.0  ;;  %v1740_v37 = vpop.f32.mrb[1].mxu0  ;;  %v611_v61 = vsub.f32 0.0, %v430_v36  ;;  %v610_v9 = vmax.f32 %v430_v36, 0.0 }
  0xff   : > { %v433_v38 = vpop.f32.mrb[2].mxu0 }
 0x100   : > { %655 = vrot.lane.b32.xlu0 %v653_v15, %s1990_s1  ;;  %v1741_v39 = vpop.f32.mrb[3].mxu0  ;;  %v612_v62 = vmax.f32 %v611_v61, 0.0 }
 0x103   : > { %v598_v3 = vpop.f32.mrb[4].mxu1 }
 0x104   : > { %v1764_v4 = vpop.f32.mrb[5].mxu1  ;;  %v604_v20 = vsub.f32 0.0, %v598_v3  ;;  %v914_v3 = vand.u32 127, %v693_v41  ;;  %v691_v41 = vld [vmem:[#allocation5] sm:$0xff] }
 0x105   : > { %v2173_v63 = vpop.f32.mrb[4].mxu0  ;;  %v601_v5 = vpop.f32.mrb[6].mxu1 }
 0x106   : > { %v1756_v0 = vpop.f32.mrb[5].mxu0  ;;  %v1765_v6 = vpop.f32.mrb[7].mxu1  ;;  %vm915_vm15 = vcmp.eq.s32.totalorder %v2152_v43, %v914_v3 }
 0x107   : > { %v545_v1 = vpop.f32.mrb[6].mxu0  ;;  %v1680_v4 = vsel %vm915_vm15, 1.0, %v1988_v7 }
 0x108   : > { %v1757_v2 = vpop.f32.mrb[7].mxu0 }
 0x172   : > { %v656_v17 = vpop.permute.xlu0 %655 }
 0x173   : > { %v658_v18 = vsel %vm617_vm7, %v651_v16, %v656_v17 }
 0x174   : > { %671 = vrot.lane.b32.xlu1 %v658_v18, %s1991_s26  ;;  %668 = vrot.lane.b32.xlu0 %v658_v18, %s1992_s27 }
 0x178   : > { %660 = vrot.lane.b32.xlu1 %v658_v18, %s1993_s29  ;;  %663 = vrot.lane.b32.xlu0 %v658_v18, %s1994_s30 }
 0x1e6   : > { %v672_v21 = vpop.permute.xlu1 %671  ;;  %v669_v22 = vpop.permute.xlu0 %668 }
 0x1e7   : > { %v674_v23 = vsel %vm635_vm8, %v669_v22, %v672_v21  ;;  %v605_v21 = vmul.f32 1.442695, %v604_v20 }
 0x1e8   : > { %v675_v24 = vmul.f32 %v674_v23, %v658_v18 }
 0x1ea   : > { %677 = vrot.lane.b32.xlu1 %v675_v24, %s1995_s6  ;;  %v661_v25 = vpop.permute.xlu1 %660  ;;  %v664_v26 = vpop.permute.xlu0 %663  ;;  %v695_v24 = vstv %s1675_s10 }
 0x1eb   : > { %v666_v27 = vsel %vm626_vm9, %v661_v25, %v664_v26  ;;  %v696_v25 = vadd.s32 %v695_v24, %v2152_v43 }
 0x1ec   : > { %v667_v28 = vmul.f32 %v666_v27, %v658_v18 }
 0x1ed   : > { %vm800_vm13 = vcmp.eq.s32.totalorder %v696_v25, 0 }
 0x25c   : > { %v678_v29 = vpop.permute.xlu1 %677 }
 0x25d   : > { %v680_v30 = vsel %vm642_vm10, %v667_v28, %v678_v29 }
 0x25e   : > { %v681_v31 = vsel %vm392_vm6, %v680_v30, 0.0 }
 0x25f   : > { %682 = vadd.xlane.f32.xlu0 %v681_v31 }
 0x2ec   : > { %v683_v40 = vpop.xlane.xlu0 %682 }
 0x2ed   : > { %vm684_vm11 = vcmp.eq.f32.partialorder %v683_v40, 0.0 }
 0x2ee   : > { %v685_v42 = vsel %vm684_vm11, 1.0, %v683_v40 }
 0x2ef   : > { %1919 = vrcp.f32 %v685_v42 }
 0x2f0   : > { %1921 = vpow2.f32 %v605_v21 }
 0x2f9   : > { %v1920_v47 = vpop.eup %1919 }
 0x2fa   : > { %v2157_v48 = vmul.f32 %v1920_v47, %v680_v30  ;;  %v1922_v22 = vpop.eup %1921 }
 0x2fb   : > { %v607_v23 = vadd.f32 1.0, %v1922_v22 }
 0x2fc   : > { %v795_v49 = vmul.f32 %v2155_v46, %v2157_v48  ;;  %v1487_v50 = vsel %vm392_vm6, %v2157_v48, 0.0  ;;  %v697_v51 = vpack.c.bf16 %v2157_v48, %v2157_v48 }
 0x2fd   : > { %v1488_v52 = vrot.slane %v1487_v50, 4  ;;  %1923 = vrcp.f32 %v607_v23 }
 0x2fe   : > { %v796_v53 = vsel %vm392_vm6, %v795_v49, 0.0  ;;  %v699_v54 = vsel %vm392_vm6, %v697_v51, 0 }
 0x2ff   : > { %v1489_v55 = vadd.f32 %v1488_v52, %v1487_v50  ;;  %797 = vadd.xlane.f32.xlu0 %v796_v53  ;;  %1767 = vmatpush3.bf16.xpose.msra.mxu0 %v699_v54 }
 0x300   : > { %1773 = vmatpush3.bf16.xpose.msra.mxu1 %v699_v54  ;;  %1778 = vmatprep.subr.bf16.mxu0 %v1988_v7 }
 0x301   : > { %v1490_v56 = vrot.slane %v1489_v55, 2  ;;  %1784 = vmatprep.subr.bf16.mxu1 %v1988_v7 }
 0x303   : > { %v1491_v57 = vadd.f32 %v1490_v56, %v1489_v55 }
 0x305   : > { %v1492_v58 = vrot.slane %v1491_v57, 1 }
 0x306   : > { %1769 = vmatmul.mubr.msk.bf16.vlgmr.msra.gmra.mrb[8].mxu0 %vm392_vm6, %v697_v51 }
 0x307   : > { %v1493_v59 = vadd.f32 %v1492_v58, %v1491_v57  ;;  %1780 = vmatprep.mubr.msk.bf16.mxu0 %vm1989_vm5, %v1988_v7  ;;  %v1924_v27 = vpop.eup %1923 }
 0x309   : > { %v1494_v60 = vadd.f32 %v1493_v59, %v689_v45 }
 0x30b   : > { %1496 = vst.msk [vmem:[#allocation3] sm:$0x1] %vm1495_vm12, %v1494_v60  ;;  %v2216_v60 = vld [vmem:[#allocation2] sm:$0xff] }
 0x30c   : > { %v867_v61 = vpack.c.bf16 %v2216_v60, %v2216_v60 }
 0x30e   : > { %v2223_v2 = vsel %vm392_vm6, %v867_v61, 0 }
 0x315   : > { %614 = vrot.lane.b32.xlu0 %v612_v62, %s1990_s1 }
 0x38c   : > { %v798_v8 = vpop.xlane.xlu0 %797 }
 0x390   : > { %v615_v10 = vpop.permute.xlu0 %614 }
 0x391   : > { %v2176_v11 = vsel %vm617_vm7, %v610_v9, %v615_v10 }
 0x392   : > { %632 = vrot.lane.b32.xlu0 %v2176_v11, %s1991_s26 }
 0x396   : > { %623 = vrot.lane.b32.xlu0 %v2176_v11, %s1994_s30 }
 0x3d9   : > { %v735_v13 = vpop.f32.mrb[8].mxu0 }
 0x3da   : > { %v785_v14 = vmul.f32 %v735_v13, %v690_v12  ;;  %v1770_v15 = vpop.f32.mrb[9].mxu0 }
 0x3db   : > { %v738_v16 = vpop.f32.mrb[10].mxu0 }
 0x3dc   : > { %v1771_v17 = vpop.f32.mrb[11].mxu0  ;;  %v786_v18 = vsel %vm617_vm7, %v785_v14, 0.0 }
 0x3dd   : > { %787 = vadd.xlane.f32.xlu1 %v786_v18 }
 0x404   : > { %v633_v37 = vpop.permute.xlu0 %632 }
 0x408   : > { %v624_v52 = vpop.permute.xlu0 %623 }
 0x46a   : > { %v788_v26 = vpop.xlane.xlu1 %787 }
 0x46b   : > { %v799_v28 = vadd.f32 %v798_v8, %v788_v26 }
 0x46d   : > { %v801_v29 = vsel %vm800_vm13, 1.0, %v799_v28 }
 0x46e   : > { %v811_v30 = vadd.f32 1e-05, %v801_v29  ;;  %v814_v31 = vmul.f32 %v1924_v27, %v801_v29 }
 0x470   : > { %1925 = vrcp.f32 %v811_v30  ;;  %863 = vperm.xlu1 %1909, %v814_v31  }
 0x474   : > { %629 = vrot.lane.b32.xlu1 %v2176_v11, %s1992_s27 }
 0x478   : > { %620 = vrot.lane.b32.xlu1 %v2176_v11, %s1993_s29 }
 0x47a   : > { %v1926_v32 = vpop.eup %1925 }
 0x47b   : > { %v815_v33 = vmul.f32 %v1926_v32, %v2157_v48 }
 0x47d   : > { %v2190_v34 = vpack.c.bf16 %v815_v33, %v815_v33 }
 0x47f   : > { %v2194_v35 = vsel %vm392_vm6, %v2190_v34, 0 }
 0x480   : > { %1779 = vmatpush3.bf16.xpose.msra.mxu0 %v2194_v35 }
 0x481   : > { %1790 = vmatprep.subr.mxu0 %v1988_v7 }
 0x487   : > { %1781 = vmatmul.mubr.msk.bf16.vlgmr.msra.gmra.mrb[12].mxu0 %vm392_vm6, %v2190_v34 }
 0x488   : > { %1792 = vmatprep.mubr.msk.f32.mxu0 %vm1989_vm5, %v1988_v7 }
 0x4ef   : > { %v2202_v36 = vpop.permute.xlu1 %863 }
 0x4f3   : > { %v630_v38 = vpop.permute.xlu1 %629 }
 0x4f4   : > { %v636_v39 = vsel %vm635_vm8, %v630_v38, %v633_v37 }
 0x4f5   : > { %v637_v40 = vmul.f32 %v636_v39, %v2176_v11 }
 0x4f7   : > { %639 = vrot.lane.b32.xlu1 %v637_v40, %s1995_s6  ;;  %v621_v51 = vpop.permute.xlu1 %620 }
 0x4f8   : > { %v627_v53 = vsel %vm626_vm9, %v621_v51, %v624_v52 }
 0x4f9   : > { %v628_v54 = vmul.f32 %v627_v53, %v2176_v11 }
 0x55a   : > { %v854_v42 = vpop.f32.mrb[12].mxu0 }
 0x55b   : > { %v860_v44 = vmul.f32 %v854_v42, %v690_v12  ;;  %v1782_v45 = vpop.f32.mrb[13].mxu0 }
 0x55c   : > { %v857_v47 = vpop.f32.mrb[14].mxu0 }
 0x55d   : > { %v866_v48 = vmul.f32 %v2202_v36, %v860_v44  ;;  %v1783_v49 = vpop.f32.mrb[15].mxu0 }
 0x55f   : > { %v918_v50 = vsub.f32 0.0, %v866_v48 }
 0x561   : > { %1791 = vmatpush3.msra.mxu0 %v918_v50  ;;  %v919_v5 = vadd.f32 %v1680_v4, %v918_v50 }
 0x562   : > { %1793 = vmatmul.mubr.msk.f32.vlgmr.msra.gmra.mrb[16].mxu0 %vm617_vm7, %v918_v50  ;;  %1800 = vmatprep.subr.mxu0 %v1988_v7 }
 0x563   : > { %1802 = vmatprep.mubr.msk.f32.mxu0 %vm1989_vm5, %v1988_v7 }
 0x569   : > { %v640_v55 = vpop.permute.xlu1 %639 }
 0x56a   : > { %v643_v56 = vsel %vm642_vm10, %v628_v54, %v640_v55 }
 0x56b   : > { %v644_v57 = vsel %vm392_vm6, %v643_v56, 0.0 }
 0x56c   : > { %645 = vadd.xlane.f32.xlu0 %v644_v57 }
 0x5f9   : > { %v646_v58 = vpop.xlane.xlu0 %645 }
 0x5fa   : > { %vm647_vm14 = vcmp.eq.f32.partialorder %v646_v58, 0.0 }
 0x5fb   : > { %v648_v59 = vsel %vm647_vm14, 1.0, %v646_v58 }
 0x5fc   : > { %1927 = vrcp.f32 %v648_v59 }
 0x606   : > { %v1928_v62 = vpop.eup %1927 }
 0x607   : > { %v650_v0 = vmul.f32 %v1928_v62, %v643_v56 }
 0x609   : > { %v2220_v1 = vpack.c.bf16 %v650_v0, %v650_v0  ;;  %v806_v14 = vmul.f32 %v2155_v46, %v650_v0 }
 0x60b   : > { %1775 = vmatmul.mubr.msk.bf16.vlgmr.msra.gmra.mrb[8].mxu1 %vm392_vm6, %v2220_v1  ;;  %v807_v15 = vsel %vm392_vm6, %v806_v14, 0.0 }
 0x60c   : > { %1785 = vmatpush3.bf16.xpose.msra.mxu1 %v2223_v2  ;;  %1786 = vmatprep.mubr.msk.bf16.mxu1 %vm1989_vm5, %v1988_v7 }
 0x60d   : > { %1795 = vmatprep.subr.mxu1 %v1988_v7 }
 0x613   : > { %1787 = vmatmul.mubr.msk.bf16.vlgmr.msra.gmra.mrb[12].mxu1 %vm392_vm6, %v2190_v34 }
 0x614   : > { %1797 = vmatprep.mubr.msk.f32.mxu1 %vm1989_vm5, %v1988_v7 }
 0x635   : > { %v989_v6 = vpop.f32.mrb[16].mxu0 }
 0x636   : > { %v1794_v8 = vpop.f32.mrb[17].mxu0  ;;  %1796 = vmatpush3.msra.mxu1 %v989_v6  ;;  %1801 = vmatpush3.msra.mxu0 %v989_v6 }
 0x637   : > { %1798 = vmatmul.mubr.msk.f32.vlgmr.msra.gmra.mrb[16].mxu1 %vm617_vm7, %v919_v5  ;;  %1803 = vmatmul.mubr.msk.f32.vlgmr.msra.gmra.mrb[18].mxu0 %vm617_vm7, %v989_v6 }
 0x638   : > { %1810 = vmatprep.subr.mxu0 %v1988_v7  ;;  %1805 = vmatprep.subr.mxu1 %v1988_v7 }
 0x639   : > { %1807 = vmatprep.mubr.msk.f32.mxu1 %vm1989_vm5, %v1988_v7  ;;  %1812 = vmatprep.mubr.msk.f32.mxu0 %vm1989_vm5, %v1988_v7 }
 0x6de   : > { %v779_v43 = vpop.f32.mrb[8].mxu1 }
 0x6df   : > { %v802_v9 = vmul.f32 %v779_v43, %v691_v41  ;;  %v1776_v10 = vpop.f32.mrb[9].mxu1 }
 0x6e0   : > { %v782_v11 = vpop.f32.mrb[10].mxu1 }
 0x6e1   : > { %v1777_v12 = vpop.f32.mrb[11].mxu1  ;;  %v803_v13 = vsel %vm617_vm7, %v802_v9, 0.0 }
 0x6e2   : > { %804 = vadd.xlane.f32.xlu0 %v803_v13 }
 0x6e6   : > { %808 = vadd.xlane.f32.xlu0 %v807_v15  ;;  %v905_v16 = vpop.f32.mrb[12].mxu1 }
 0x6e7   : > { %v911_v17 = vsub.f32 %v2173_v63, %v905_v16  ;;  %v1788_v18 = vpop.f32.mrb[13].mxu1  ;;  %v1443_v63 = vsel %vm1333_vm0, %v2190_v34, 0 }
 0x6e8   : > { %v908_v19 = vpop.f32.mrb[14].mxu1 }
 0x6e9   : > { %v912_v20 = vmul.f32 %v911_v17, %v2202_v36  ;;  %v1789_v21 = vpop.f32.mrb[15].mxu1 }
 0x6eb   : > { %1811 = vmatpush3.msra.mxu0 %v912_v20 }
 0x6ec   : > { %1821 = vmatprep.subr.bf16.mxu0 %v1988_v7 }
 0x70a   : > { %v1062_v22 = vpop.f32.mrb[16].mxu1  ;;  %v1136_v23 = vpop.f32.mrb[18].mxu0 }
 0x70b   : > { %v1066_v24 = vadd.f32 %v1062_v22, %v919_v5  ;;  %v1799_v25 = vpop.f32.mrb[17].mxu1  ;;  %v1804_v46 = vpop.f32.mrb[19].mxu0  ;;  %1806 = vmatpush3.msra.mxu1 %v1136_v23 }
 0x70c   : > { %1815 = vmatprep.subr.bf16.mxu1 %v1988_v7 }
 0x70d   : > { %1808 = vmatmul.mubr.msk.f32.vlgmr.msra.gmra.mrb[18].mxu1 %vm617_vm7, %v1066_v24 }
 0x70e   : > { %1817 = vmatprep.mubr.msk.bf16.mxu1 %vm1989_vm5, %v1988_v7 }
 0x712   : > { %1816 = vmatpush3.bf16.xpose.msra.mxu1 %v2194_v35 }
 0x713   : > { %1833 = vmatprep.subr.bf16.mxu1 %v1988_v7 }
 0x719   : > { %1818 = vmatmul.mubr.msk.bf16.vlgmr.msra.gmra.mrb[20].mxu1 %vm392_vm6, %v2220_v1 }
 0x71a   : > { %1834 = vmatpush3.bf16.msra.mxu1 %v1443_v63  ;;  %1835 = vmatprep.mubr.msk.bf16.mxu1 %vm1989_vm5, %v1988_v7 }
 0x76f   : > { %v805_v40 = vpop.xlane.xlu0 %804 }
 0x773   : > { %v809_v42 = vpop.xlane.xlu0 %808 }
 0x774   : > { %v810_v44 = vadd.f32 %v809_v42, %v805_v40 }
 0x776   : > { %v1418_v45 = vadd.f32 1e-05, %v810_v44 }
 0x778   : > { %1929 = vrcp.f32 %v1418_v45 }
 0x782   : > { %v1930_v50 = vpop.eup %1929 }
 0x7e0   : > { %v1209_v26 = vpop.f32.mrb[18].mxu1 }
 0x7e1   : > { %v1213_v27 = vadd.f32 %v1209_v26, %v1066_v24  ;;  %v1809_v28 = vpop.f32.mrb[19].mxu1 }
 0x7e3   : > { %1813 = vmatmul.mubr.msk.f32.vlgmr.msra.gmra.mrb[20].mxu0 %vm617_vm7, %v1213_v27 }
 0x7e4   : > { %1823 = vmatprep.mubr.msk.bf16.mxu0 %vm1989_vm5, %v1988_v7 }
 0x7ec   : > { %v1321_v29 = vpop.f32.mrb[20].mxu1 }
 0x7ed   : > { %v1819_v30 = vpop.f32.mrb[21].mxu1  ;;  %v1327_v35 = vmul.f32 %v1321_v29, %v691_v41 }
 0x7ee   : > { %v1324_v31 = vpop.f32.mrb[22].mxu1 }
 0x7ef   : > { %v1820_v32 = vpop.f32.mrb[23].mxu1  ;;  %v1328_v38 = vpack.c.bf16 %v1327_v35, %v1327_v35 }
 0x8b6   : > { %v1283_v33 = vpop.f32.mrb[20].mxu0 }
 0x8b7   : > { %v1329_v36 = vpack.c.bf16 %v1283_v33, %v1283_v33  ;;  %v1814_v34 = vpop.f32.mrb[21].mxu0 }
 0x8b9   : > { %v1335_v37 = vsel %vm1333_vm0, %v1329_v36, 0  ;;  %1424 = vxpose.xlu1.c.b16.start.end [1/1] (short) (narrow) %v1329_v36, 16 }
 0x8ba   : > { %1822 = vmatpush3.bf16.msra.mxu0 %v1335_v37 }
 0x8bb   : > { %1827 = vmatprep.subr.bf16.mxu0 %v1988_v7 }
 0x8bd   : > { %1824 = vmatmul.mubr.msk.bf16.vlgmr.msra.gmra.mrb[24].mxu0 %vm617_vm7, %v1328_v38 }
 0x8be   : > { %1829 = vmatprep.mubr.msk.bf16.mxu0 %vm1989_vm5, %v1988_v7 }
 0x8c3   : > { %1828 = vmatpush3.bf16.xpose.msra.mxu0 %v2223_v2 }
 0x8ca   : > { %1830 = vmatmul.mubr.msk.bf16.vlgmr.msra.gmra.mrb[24].mxu0 %vm392_vm6, %v2220_v1 }
 0x91f   : > { %v1432_v39 = vpop.trf.xlu1 }
 0x920   : > { %1836 = vmatmul.mubr.msk.bf16.vlgmr.msra.gmra.mrb[24].mxu1 %vm617_vm7, %v1432_v39 }
 0x99d   : > { %v1411_v47 = vpop.f32.mrb[24].mxu0 }
 0x99e   : > { %v1417_v48 = vmul.f32 0.35355338, %v1411_v47  ;;  %v1831_v49 = vpop.f32.mrb[25].mxu0 }
 0x99f   : > { %v1414_v51 = vpop.f32.mrb[26].mxu0 }
 0x9a0   : > { %v1420_v7 = vmul.f32 %v1930_v50, %v1417_v48  ;;  %v1832_v52 = vpop.f32.mrb[27].mxu0 }
 0x9a2   : > { %v1421_v53 = vpack.c.bf16 %v1420_v7, %v1420_v7 }
 0x9a4   : > { %1423 = vst.msk [vmem:[%s2098_s7] sm:$0xf] %vm1422_vm1, %v1421_v53 }
 0x9f3   : > { %v1479_v54 = vpop.f32.mrb[24].mxu1 }
 0x9f4   : > { %v1485_v55 = vadd.f32 %v1479_v54, %v2216_v60  ;;  %v1837_v56 = vpop.f32.mrb[25].mxu1 }
 0x9f5   : > { %v1482_v57 = vpop.f32.mrb[26].mxu1 }
 0x9f6   : > { %1486 = vst.msk [vmem:[#allocation2] sm:$0xff] %vm392_vm6, %v1485_v55  ;;  %v1838_v58 = vpop.f32.mrb[27].mxu1 }
 0x9f7 PF: > { %s15_s24 = sadd.s32 1, %s1985_s24   ;;  %s2310_s12 = sld [smem:[#allocation6_spill]] }
 0x9f8   : > { %p12_p9 = scmp.ge.s32.totalorder %s15_s24, 18   ;;  %s2311_s13 = sld [smem:[#allocation7_spill]] }
 0x9f9   : > { %s2312_s18 = smov %s1973_s21  ;;  %s2313_s19 = smov %s1977_s22 }
 0x9fa   : > { %s2314_s20 = smov %s1981_s23  ;;  %s2315_s21 = smov %s2319_s25 }
 0x9fb   :  { %14 = sbr.rel (!%p12_p9) target bundleno = 4 (0x4), region = 86 }
 0x9fd   : > { %s2316_s22 = smov %s2310_s12 }
 0x9fe   : > { %s2317_s23 = smov %s2311_s13 }

</bundles_post_ra>
